<compile_context>
chip_gen: v7x
topology: tpu7x:2x2x1
jax: 0.10.0
libtpu: 0.0.40
codegen_flags: <defaults>
</compile_context>

<pallas_src>
import functools

import jax
import jax.numpy as jnp
from jax.experimental import pallas as pl
from jax.experimental.pallas import tpu as pltpu


def _round_up(x, m):
    return (x + m - 1) // m * m


def _make_conv_kernel(KH, KW, Wp, TM):
    """One (batch, spatial-tile) grid step: single tap-folded matmul."""
    offs = tuple(kh * Wp + kw for kh in range(KH) for kw in range(KW))

    def kernel(x_ref, w_ref, b_ref, o_ref):
        # x_ref: (C_pad, TILE_L)        spatial tile incl. halo, lanes = flat spatial
        # w_ref: (O_pad, KH*KW*C_pad)   tap-folded weights (resident)
        # b_ref: (O_pad, 1)             bias column (f32, resident)
        # o_ref: (O_pad, TM)            lane-dense output tile in NC(H*W) layout
        xs = jnp.concatenate([x_ref[:, off:off + TM] for off in offs], axis=0)
        acc = jnp.dot(w_ref[...], xs, preferred_element_type=jnp.float32)
        o_ref[...] = (acc + b_ref[...]).astype(o_ref.dtype)

    return kernel


def convolution_forward(inputs, weights, bias=None, padding=None,
                        compute_dtype=jnp.float32):
    if padding is None:
        padding = 0
    B, C, H, W = inputs.shape
    O, Cw, KH, KW = weights.shape
    assert C == Cw, "channel mismatch"
    if bias is None:
        bias = jnp.zeros((O,), dtype=jnp.float32)
    bias = jnp.reshape(bias, (-1,)).astype(jnp.float32)      # accepts (O,) or (O,1)

    OHv = H - KH + 1            # region actually computed by the reference loops
    OWv = W - KW + 1
    OH = OHv + 2 * padding      # allocated output spatial size (reference quirk)
    OW = OWv + 2 * padding
    Hp = H + 2 * padding
    Wp = W + 2 * padding

    compute_dtype = jnp.dtype(compute_dtype)
    itemsize = compute_dtype.itemsize
    sub = 8 * 4 // itemsize                                   # 8 for f32, 16 for bf16
    C_pad = _round_up(C, sub)
    O_pad = _round_up(O, 8)
    Kc = KH * KW * C_pad                                      # folded contraction dim

    M_full = OHv * Wp                                         # computed positions / batch
    halo = (KH - 1) * Wp + (KW - 1)

    # Lane tile: 512 preferred (v5e store-slot friendly), shrink if the f32
    # accumulator (O_pad, TM) would approach the vreg file (review #9).
    TM = min(512, _round_up(M_full, 128))
    while TM > 128 and O_pad * TM * 4 > 64 * 1024:
        TM = _round_up(TM // 2, 128)
    M_pad = _round_up(M_full, TM)
    n_m_tiles = M_pad // TM
    TILE_L = _round_up(TM + halo, 128)

    # ---- wrapper-side prep: zero-pad, flatten to NC(H*W), pre-cut haloed tiles ----
    xp = jnp.pad(inputs.astype(jnp.float32),
                 ((0, 0), (0, 0), (padding, padding), (padding, padding)))
    L = max(Hp * Wp, (n_m_tiles - 1) * TM + TILE_L)           # halo reads stay in-bounds (zeros)
    x_flat = jnp.pad(xp.reshape(B, C, Hp * Wp),
                     ((0, 0), (0, C_pad - C), (0, L - Hp * Wp)))
    # (B, n_m_tiles, C_pad, TILE_L): each tile already contains its conv halo, so
    # the kernel's slices are static and no per-batch slab stays resident.
    x_tiles = jnp.stack([x_flat[:, :, mt * TM: mt * TM + TILE_L]
                         for mt in range(n_m_tiles)], axis=1).astype(compute_dtype)

    # tap-folded weights: w_k[o, (kh*KW + kw)*C_pad + c] = weights[o, c, kh, kw]
    w_k = jnp.pad(weights.astype(jnp.float32).transpose(0, 2, 3, 1),
                  ((0, O_pad - O), (0, 0), (0, 0), (0, C_pad - C)))
    w_k = w_k.reshape(O_pad, Kc).astype(compute_dtype)
    b_k = jnp.pad(bias[:O], (0, O_pad - O)).reshape(O_pad, 1)  # keep f32

    kernel = _make_conv_kernel(KH, KW, Wp, TM)

    # VMEM budget: double-buffered blocks + folded-operand temp; cap at 48 MiB so
    # the same build is safe on v7x's 64 MiB while v5e/v6e keep headroom.
    x_blk = C_pad * TILE_L * itemsize
    w_bytes = O_pad * Kc * itemsize
    o_blk = O_pad * TM * 4
    vmem_need = 2 * (x_blk + w_bytes + O_pad * 4 + o_blk) + Kc * TM * 4
    vmem_limit = int(min(48 * 1024 * 1024, max(16 * 1024 * 1024, 4 * vmem_need)))

    flops = 2 * B * M_full * KH * KW * C * O
    bytes_accessed = int(B * n_m_tiles * x_blk + w_bytes + O_pad * 4
                         + 4 * B * O_pad * M_pad)

    out_flat = pl.pallas_call(
        kernel,
        out_shape=jax.ShapeDtypeStruct((B, O_pad, M_pad), jnp.float32),
        grid_spec=pltpu.PrefetchScalarGridSpec(
            num_scalar_prefetch=0,
            grid=(B, n_m_tiles),
            in_specs=[
                # per-(batch, tile) haloed input block
                pl.BlockSpec((None, None, C_pad, TILE_L), lambda b, mt: (b, mt, 0, 0)),
                # resident tap-folded weights / bias (constant index_map)
                pl.BlockSpec((O_pad, Kc), lambda b, mt: (0, 0)),
                pl.BlockSpec((O_pad, 1), lambda b, mt: (0, 0)),
            ],
            out_specs=pl.BlockSpec((None, O_pad, TM), lambda b, mt: (b, 0, mt)),
        ),
        compiler_params=pltpu.CompilerParams(
            dimension_semantics=("parallel", "parallel"),   # megacore: B * n_m_tiles units
            vmem_limit_bytes=vmem_limit,
        ),
        cost_estimate=pl.CostEstimate(
            flops=flops, transcendentals=0, bytes_accessed=bytes_accessed),
    )(x_tiles, w_k, b_k)

    # NC(H*W) -> NCHW: drop channel/spatial padding and the wrap-around garbage
    # columns, then zero-pad bottom/right exactly like the reference module.
    out = out_flat[:, :O, :M_full].reshape(B, O, OHv, Wp)[:, :, :, :OWv]
    out = jnp.pad(out, ((0, 0), (0, 0), (0, OH - OHv), (0, OW - OWv)))
    return out


if __name__ == "__main__":
    key = jax.random.PRNGKey(0)
    kx, kw_, kb = jax.random.split(key, 3)

    B, C, H, W = 2, 4, 16, 16
    O, KH, KW = 8, 3, 3
    pad = 1

    # Integer-valued test data keeps every product / partial sum exactly
    # representable whichever MXU precision mode (f32 passes or bf16) is used,
    # so both the f32 and bf16 builds can be checked with tight tolerances.
    x = jax.random.randint(kx, (B, C, H, W), -3, 4).astype(jnp.float32)
    w = jax.random.randint(kw_, (O, C, KH, KW), -3, 4).astype(jnp.float32)
    b = 0.25 * jax.random.randint(kb, (O,), -4, 5).astype(jnp.float32)

    # Independent XLA reference reproducing the module's output semantics.
    OHv, OWv = H - KH + 1, W - KW + 1
    ref_full = jax.lax.conv_general_dilated(
        x, w, window_strides=(1, 1), padding=((pad, pad), (pad, pad)),
        dimension_numbers=("NCHW", "OIHW", "NCHW"))
    ref = ref_full[:, :, :OHv, :OWv] + b[None, :, None, None]
    ref = jnp.pad(ref, ((0, 0), (0, 0), (0, 2 * pad), (0, 2 * pad)))

    # f32 build (default, v5e-friendly)
    conv_f32 = jax.jit(functools.partial(convolution_forward, padding=pad))
    out = jax.block_until_ready(conv_f32(x, w, b))
    assert out.shape == (B, O, OHv + 2 * pad, OWv + 2 * pad), out.shape
    assert jnp.allclose(out, ref, atol=1e-4, rtol=1e-4), float(jnp.abs(out - ref).max())

    # bf16-operand build (v6e/v7x HBM-bytes win; accumulation stays f32)
    conv_bf16 = jax.jit(functools.partial(convolution_forward, padding=pad,
                                          compute_dtype=jnp.bfloat16))
    out_bf = jax.block_until_ready(conv_bf16(x, w, b))
    assert jnp.allclose(out_bf, ref, atol=1e-3, rtol=1e-3), float(jnp.abs(out_bf - ref).max())

    print("KERNEL_OK")
</pallas_src>

<mosaic_0001>
module attributes {stable_mosaic.version = 11 : i64} {
  func.func @kernel(%arg0: i32, %arg1: i32, %arg2: memref<1x1x8x384xf32, #tpu.memory_space<vmem>>, %arg3: memref<8x72xf32, #tpu.memory_space<vmem>>, %arg4: memref<8x1xf32, #tpu.memory_space<vmem>>, %arg5: memref<1x8x256xf32, #tpu.memory_space<vmem>>) attributes {dimension_semantics = [#tpu.dimension_semantics<parallel>, #tpu.dimension_semantics<parallel>], iteration_bounds = array<i64: 2, 1>, scalar_prefetch = 0 : i64, scratch_operands = 0 : i64, tpu.core_type = #tpu.core_type<tc>, window_params = [{transform_indices = @transform_0, window_bounds = array<i64: 1, 1, 8, 384>}, {pipeline_mode = #tpu.pipeline_mode<synchronous>, transform_indices = @transform_1, window_bounds = array<i64: 8, 72>}, {pipeline_mode = #tpu.pipeline_mode<synchronous>, transform_indices = @transform_2, window_bounds = array<i64: 8, 1>}, {transform_indices = @transform_3, window_bounds = array<i64: 1, 8, 256>}]} {
    %c0 = arith.constant 0 : index
    %c0_0 = arith.constant 0 : index
    %c0_1 = arith.constant 0 : index
    %c0_2 = arith.constant 0 : index
    %0 = vector.load %arg2[%c0, %c0_0, %c0_1, %c0_2] : memref<1x1x8x384xf32, #tpu.memory_space<vmem>>, vector<1x1x8x256xf32>
    %1 = vector.shape_cast %0 : vector<1x1x8x256xf32> to vector<8x256xf32>
    %c0_3 = arith.constant 0 : index
    %c0_4 = arith.constant 0 : index
    %c0_5 = arith.constant 0 : index
    %c1 = arith.constant 1 : index
    %2 = vector.load %arg2[%c0_3, %c0_4, %c0_5, %c1] : memref<1x1x8x384xf32, #tpu.memory_space<vmem>>, vector<1x1x8x256xf32>
    %3 = vector.shape_cast %2 : vector<1x1x8x256xf32> to vector<8x256xf32>
    %c0_6 = arith.constant 0 : index
    %c0_7 = arith.constant 0 : index
    %c0_8 = arith.constant 0 : index
    %c2 = arith.constant 2 : index
    %4 = vector.load %arg2[%c0_6, %c0_7, %c0_8, %c2] : memref<1x1x8x384xf32, #tpu.memory_space<vmem>>, vector<1x1x8x256xf32>
    %5 = vector.shape_cast %4 : vector<1x1x8x256xf32> to vector<8x256xf32>
    %c0_9 = arith.constant 0 : index
    %c0_10 = arith.constant 0 : index
    %c0_11 = arith.constant 0 : index
    %c18 = arith.constant 18 : index
    %6 = vector.load %arg2[%c0_9, %c0_10, %c0_11, %c18] : memref<1x1x8x384xf32, #tpu.memory_space<vmem>>, vector<1x1x8x256xf32>
    %7 = vector.shape_cast %6 : vector<1x1x8x256xf32> to vector<8x256xf32>
    %c0_12 = arith.constant 0 : index
    %c0_13 = arith.constant 0 : index
    %c0_14 = arith.constant 0 : index
    %c19 = arith.constant 19 : index
    %8 = vector.load %arg2[%c0_12, %c0_13, %c0_14, %c19] : memref<1x1x8x384xf32, #tpu.memory_space<vmem>>, vector<1x1x8x256xf32>
    %9 = vector.shape_cast %8 : vector<1x1x8x256xf32> to vector<8x256xf32>
    %c0_15 = arith.constant 0 : index
    %c0_16 = arith.constant 0 : index
    %c0_17 = arith.constant 0 : index
    %c20 = arith.constant 20 : index
    %10 = vector.load %arg2[%c0_15, %c0_16, %c0_17, %c20] : memref<1x1x8x384xf32, #tpu.memory_space<vmem>>, vector<1x1x8x256xf32>
    %11 = vector.shape_cast %10 : vector<1x1x8x256xf32> to vector<8x256xf32>
    %c0_18 = arith.constant 0 : index
    %c0_19 = arith.constant 0 : index
    %c0_20 = arith.constant 0 : index
    %c36 = arith.constant 36 : index
    %12 = vector.load %arg2[%c0_18, %c0_19, %c0_20, %c36] : memref<1x1x8x384xf32, #tpu.memory_space<vmem>>, vector<1x1x8x256xf32>
    %13 = vector.shape_cast %12 : vector<1x1x8x256xf32> to vector<8x256xf32>
    %c0_21 = arith.constant 0 : index
    %c0_22 = arith.constant 0 : index
    %c0_23 = arith.constant 0 : index
    %c37 = arith.constant 37 : index
    %14 = vector.load %arg2[%c0_21, %c0_22, %c0_23, %c37] : memref<1x1x8x384xf32, #tpu.memory_space<vmem>>, vector<1x1x8x256xf32>
    %15 = vector.shape_cast %14 : vector<1x1x8x256xf32> to vector<8x256xf32>
    %c0_24 = arith.constant 0 : index
    %c0_25 = arith.constant 0 : index
    %c0_26 = arith.constant 0 : index
    %c38 = arith.constant 38 : index
    %16 = vector.load %arg2[%c0_24, %c0_25, %c0_26, %c38] : memref<1x1x8x384xf32, #tpu.memory_space<vmem>>, vector<1x1x8x256xf32>
    %17 = vector.shape_cast %16 : vector<1x1x8x256xf32> to vector<8x256xf32>
    %18 = tpu.concatenate %1, %3, %5, %7, %9, %11, %13, %15, %17 in 0 : vector<8x256xf32>, vector<8x256xf32>, vector<8x256xf32>, vector<8x256xf32>, vector<8x256xf32>, vector<8x256xf32>, vector<8x256xf32>, vector<8x256xf32>, vector<8x256xf32> -> vector<72x256xf32>
    %c0_27 = arith.constant 0 : index
    %c0_28 = arith.constant 0 : index
    %19 = vector.load %arg3[%c0_27, %c0_28] : memref<8x72xf32, #tpu.memory_space<vmem>>, vector<8x72xf32>
    %cst = arith.constant dense<0.000000e+00> : vector<8x256xf32>
    %20 = tpu.matmul %19, %18, %cst {dimension_numbers = #tpu.dot_dimension_numbers<[1], [0], [0], [1], [0, 0, 1, 1], [], []>} : vector<8x72xf32>, vector<72x256xf32>, vector<8x256xf32> -> vector<8x256xf32>
    %c0_29 = arith.constant 0 : index
    %c0_30 = arith.constant 0 : index
    %21 = vector.load %arg4[%c0_29, %c0_30] : memref<8x1xf32, #tpu.memory_space<vmem>>, vector<8x1xf32>
    %22 = vector.broadcast %21 : vector<8x1xf32> to vector<8x256xf32>
    %23 = arith.addf %20, %22 : vector<8x256xf32>
    %c0_31 = arith.constant 0 : index
    %c0_32 = arith.constant 0 : index
    %c0_33 = arith.constant 0 : index
    %24 = vector.load %arg5[%c0_31, %c0_32, %c0_33] : memref<1x8x256xf32, #tpu.memory_space<vmem>>, vector<1x8x256xf32>
    %25 = vector.shape_cast %24 : vector<1x8x256xf32> to vector<8x256xf32>
    %26 = vector.shape_cast %23 : vector<8x256xf32> to vector<1x8x256xf32>
    tpu.vector_store %arg5[%c0_31, %c0_32, %c0_33], %26 {strides = array<i32>} : memref<1x8x256xf32, #tpu.memory_space<vmem>>, vector<1x8x256xf32>,
    return
  }
  func.func @transform_0(%arg0: i32, %arg1: i32) -> (i32, i32, i32, i32) {
    %c0_i32 = arith.constant 0 : i32
    %c0_i32_0 = arith.constant 0 : i32
    %c0_i32_1 = arith.constant 0 : i32
    return %arg0, %arg1, %c0_i32, %c0_i32_0 : i32, i32, i32, i32
  }
  func.func @transform_1(%arg0: i32, %arg1: i32) -> (i32, i32) {
    %c0_i32 = arith.constant 0 : i32
    %c0_i32_0 = arith.constant 0 : i32
    %c0_i32_1 = arith.constant 0 : i32
    return %c0_i32, %c0_i32_0 : i32, i32
  }
  func.func @transform_2(%arg0: i32, %arg1: i32) -> (i32, i32) {
    %c0_i32 = arith.constant 0 : i32
    %c0_i32_0 = arith.constant 0 : i32
    %c0_i32_1 = arith.constant 0 : i32
    return %c0_i32, %c0_i32_0 : i32, i32
  }
  func.func @transform_3(%arg0: i32, %arg1: i32) -> (i32, i32, i32) {
    %c0_i32 = arith.constant 0 : i32
    %c0_i32_0 = arith.constant 0 : i32
    return %arg0, %c0_i32, %arg1 : i32, i32, i32
  }
}

</mosaic_0001>

<bundles_post_ra>
// kernel: convolution_forward.1
= control target key start
LH: loop header
LB: loop body
LE: loop exit
PB: predicated region body
PF: predicated region fallthrough
CT: control target
= control target key end

     0   :  { %s632_s12 = smov 0   ;;  %s634_s13 = smov 0   ;;  %s675_s0 = inlined_call_operand.vmem [shape: f32[2,1,8,384], index: 0, kind: input, shape index: {}]   ;;  %s676_s1 = inlined_call_operand.vmem [shape: f32[8,72], index: 1, kind: input, shape index: {}]   ;;  %s677_s2 = inlined_call_operand.vmem [shape: f32[8,1], index: 2, kind: input, shape index: {}]   ;;  %s678_s3 = inlined_call_operand.vmem [shape: f32[2,8,256], index: 3, kind: output, shape index: {}]  }
   0x1   :  { %s636_s14 = smov 0  }
   0x2 LB: > { %s25_s15 = sadd.s32 1, %s596_s13  ;;  %p482_p0 = scmp.ge.s32.totalorder %s600_s14, 1  ;;  %s600_s14 = sphi %s636_s14, %s13_s14   ;;  %s596_s13 = sphi %s634_s13, %s680_s13   ;;  %s592_s12 = sphi %s632_s12, %s679_s12  }
   0x3   : > { %p27_p1 = scmp.ge.s32.totalorder %s25_s15, 2  ;;  %p157_p2 = scmp.lt.s32.totalorder %s600_s14, 3 }
   0x5   : > { %s682_s15 = smov (%p27_p1, %s25_s15), 0  ;;  %p158_p3 = pnand %p482_p0, %p157_p2 }
   0x6   : > { %p189_p4 = scmp.lt.s32.totalorder (!%p158_p3), %s592_s12, 1  ;;  %s602_s20 = smov (!%p158_p3), 126   ;;  %v609_v4 = vmov (!%p158_p3), 0.0   ;;  %v610_v5 = vmov (!%p158_p3), 0   ;;  %v305_v6 = vld [vmem:[%s677_s2] sm:$0xff] (!%p158_p3)  ;;  %vm222_vm0 = vcmask (!%p158_p3), 1039360  }
   0x7   : > { %161 = sbr.rel (%p158_p3) target bundleno = 386 (0x182), region = 32  ;;  %s603_s21 = smov (!%p158_p3), 127   ;;  %379 = vmatprep.mubr.f32.mxu0 (!%p158_p3), %v609_v4  ;;  %576 = vset.pattern.permute.xlu1 (!%p158_p3), %v610_v5  ;;  %vm244_vm1 = vcmask (!%p158_p3), 900096   ;;  %vm233_vm2 = vcmask (!%p158_p3), 1031168   ;;  %vm266_vm3 = vcmask (!%p158_p3), 883712   ;;  %vm255_vm4 = vcmask (!%p158_p3), 891904  }
   0x8   : > { %s604_s22 = smov (!%p158_p3), 110   ;;  %s605_s23 = smov (!%p158_p3), 108   ;;  %577 = vset.pattern.permute.xlu0 (!%p158_p3), %v610_v5  ;;  %vm288_vm5 = vcmask (!%p158_p3), 744448   ;;  %vm277_vm6 = vcmask (!%p158_p3), 752640   ;;  %vm299_vm7 = vcmask (!%p158_p3), 736256   ;;  %v304_v61 = vld [vmem:[%s676_s1] sm:$0xff] (!%p158_p3) }
   0x9   : > { %s606_s24 = smov (!%p158_p3), 109   ;;  %s607_s25 = smov (!%p158_p3), 91   ;;  %vm311_vm8 = vcmask (!%p158_p3), 588800  }
   0xa   : > { %s608_s26 = smov (!%p158_p3), 92   ;;  %s611_s27 = smov (!%p158_p3), 90  }
   0xe   : > { %s684_s12 = smov (!%p189_p4, %s592_s12), 1 }
   0xf   : > { %s506_s16 = smul.u32 24, %s684_s12  ;;  %s489_s5 = sshll.u32 %s684_s12, 4 }
  0x10   : > { %s206_s8 = scalar_lea.vmem %s678_s3, %s489_s5 }
  0x11   : > { %s197_s19 = scalar_lea.vmem %s675_s0, %s506_s16 }
  0x12   : > { %v211_v0 = vld [vmem:[%s197_s19 + $0x8] sm:$0xff]  ;;  %v212_v1 = vld [vmem:[%s197_s19 + $0x10] sm:$0xff]  ;;  %v210_v3 = vld [vmem:[%s197_s19] sm:$0xff] }
  0x13   : > { %v546_v2 = vpack.i.bf16 %v212_v1, %v211_v0 }
  0x15   : > { %547 = vrot.lane.b32.xlu1 %v546_v2, %s602_s20  ;;  %542 = vrot.lane.b32.xlu0 %v546_v2, %s603_s21 }
  0x19   : > { %552 = vrot.lane.b32.xlu1 %v546_v2, %s604_s22  ;;  %216 = vrot.lane.b32.xlu0 %v210_v3, %s603_s21 }
  0x1d   : > { %238 = vrot.lane.b32.xlu1 %v210_v3, %s604_s22  ;;  %227 = vrot.lane.b32.xlu0 %v210_v3, %s602_s20 }
  0x21   : > { %562 = vrot.lane.b32.xlu1 %v546_v2, %s605_s23  ;;  %557 = vrot.lane.b32.xlu0 %v546_v2, %s606_s24 }
  0x25   : > { %260 = vrot.lane.b32.xlu1 %v210_v3, %s605_s23  ;;  %249 = vrot.lane.b32.xlu0 %v210_v3, %s606_s24 }
  0x29   : > { %572 = vrot.lane.b32.xlu1 %v546_v2, %s607_s25  ;;  %567 = vrot.lane.b32.xlu0 %v546_v2, %s608_s26 }
  0x2d   : > { %282 = vrot.lane.b32.xlu1 %v210_v3, %s607_s25  ;;  %271 = vrot.lane.b32.xlu0 %v210_v3, %s608_s26 }
  0x31   : > { %297 = vrot.lane.b32.xlu1 %v212_v1, %s611_s27  ;;  %295 = vrot.lane.b32.xlu0 %v211_v0, %s611_s27 }
  0x35   : > { %293 = vrot.lane.b32.xlu0 %v210_v3, %s611_s27  ;;  %308 = vperm.xlu1 %576, %v305_v6  }
  0x87   : > { %v548_v7 = vpop.permute.xlu1 %547  ;;  %v543_v8 = vpop.permute.xlu0 %542 }
  0x88   : > { %v545_v9 = vunpack.i.h.bf16 %v543_v8  ;;  %v544_v10 = vunpack.i.l.bf16 %v543_v8  ;;  %v550_v11 = vunpack.i.h.bf16 %v548_v7  ;;  %v549_v12 = vunpack.i.l.bf16 %v548_v7 }
  0x8a   : > { %v224_v13 = vsel %vm222_vm0, %v544_v10, %v545_v9  ;;  %v235_v21 = vsel %vm233_vm2, %v549_v12, %v550_v11 }
  0x8b   : > { %v553_v14 = vpop.permute.xlu1 %552  ;;  %v217_v15 = vpop.permute.xlu0 %216  ;;  %v490_v16 = vpack.c.bf16 %v224_v13, %v211_v0 }
  0x8c   : > { %v555_v17 = vunpack.i.h.bf16 %v553_v14  ;;  %v554_v18 = vunpack.i.l.bf16 %v553_v14  ;;  %v223_v19 = vsel %vm222_vm0, %v217_v15, %v544_v10 }
  0x8d   : > { %491 = vmatprep.subr.bf16.mxu0 %v490_v16  ;;  %v492_v20 = vpack.c.bf16 %v223_v19, %v210_v3 }
  0x8e   : > { %v246_v22 = vsel %vm244_vm1, %v554_v18, %v555_v17 }
  0x8f   : > { %v239_v23 = vpop.permute.xlu1 %238  ;;  %v228_v24 = vpop.permute.xlu0 %227  ;;  %493 = vmatpush1.bf16.msra.mxu0 %v492_v20  ;;  %v494_v25 = vpack.c.bf16 %v246_v22, %v235_v21 }
  0x90   : > { %v245_v26 = vsel %vm244_vm1, %v239_v23, %v554_v18  ;;  %v234_v27 = vsel %vm233_vm2, %v228_v24, %v549_v12 }
  0x91   : > { %v496_v28 = vpack.c.bf16 %v245_v26, %v234_v27  ;;  %495 = vmatprep.subr.bf16.mxu0 %v494_v25 }
  0x93   : > { %v563_v29 = vpop.permute.xlu1 %562  ;;  %v558_v30 = vpop.permute.xlu0 %557  ;;  %497 = vmatpush1.bf16.msra.mxu0 %v496_v28 }
  0x94   : > { %v565_v31 = vunpack.i.h.bf16 %v563_v29  ;;  %v564_v32 = vunpack.i.l.bf16 %v563_v29  ;;  %v560_v33 = vunpack.i.h.bf16 %v558_v30  ;;  %v559_v34 = vunpack.i.l.bf16 %v558_v30 }
  0x96   : > { %v257_v35 = vsel %vm255_vm4, %v559_v34, %v560_v33  ;;  %v268_v36 = vsel %vm266_vm3, %v564_v32, %v565_v31 }
  0x97   : > { %v261_v37 = vpop.permute.xlu1 %260  ;;  %v250_v38 = vpop.permute.xlu0 %249  ;;  %v498_v39 = vpack.c.bf16 %v268_v36, %v257_v35 }
  0x98   : > { %v267_v40 = vsel %vm266_vm3, %v261_v37, %v564_v32  ;;  %v256_v41 = vsel %vm255_vm4, %v250_v38, %v559_v34 }
  0x99   : > { %v500_v42 = vpack.c.bf16 %v267_v40, %v256_v41  ;;  %499 = vmatprep.subr.bf16.mxu0 %v498_v39 }
  0x9b   : > { %v573_v43 = vpop.permute.xlu1 %572  ;;  %v568_v44 = vpop.permute.xlu0 %567  ;;  %501 = vmatpush1.bf16.msra.mxu0 %v500_v42 }
  0x9c   : > { %v575_v45 = vunpack.i.h.bf16 %v573_v43  ;;  %v574_v46 = vunpack.i.l.bf16 %v573_v43  ;;  %v570_v47 = vunpack.i.h.bf16 %v568_v44  ;;  %v569_v48 = vunpack.i.l.bf16 %v568_v44 }
  0x9e   : > { %v279_v49 = vsel %vm277_vm6, %v569_v48, %v570_v47  ;;  %v290_v50 = vsel %vm288_vm5, %v574_v46, %v575_v45 }
  0x9f   : > { %v283_v51 = vpop.permute.xlu1 %282  ;;  %v272_v52 = vpop.permute.xlu0 %271  ;;  %v502_v53 = vpack.c.bf16 %v290_v50, %v279_v49 }
  0xa0   : > { %v289_v54 = vsel %vm288_vm5, %v283_v51, %v574_v46  ;;  %v278_v55 = vsel %vm277_vm6, %v272_v52, %v569_v48 }
  0xa1   : > { %v504_v56 = vpack.c.bf16 %v289_v54, %v278_v55  ;;  %503 = vmatprep.subr.bf16.mxu0 %v502_v53 }
  0xa3   : > { %v298_v57 = vpop.permute.xlu1 %297  ;;  %v296_v58 = vpop.permute.xlu0 %295  ;;  %505 = vmatpush1.bf16.msra.mxu0 %v504_v56 }
  0xa4   : > { %v301_v59 = vsel %vm299_vm7, %v296_v58, %v298_v57 }
  0xa5   : > { %331 = vmatprep.subr.mxu0 %v301_v59 }
  0xa7   : > { %v294_v60 = vpop.permute.xlu0 %293 }
  0xa8   : > { %v300_v62 = vsel %vm299_vm7, %v294_v60, %v296_v58 }
  0xa9   : > { %332 = vmatpush1.msra.mxu0 %v300_v62 }
  0xaa   : > { %486 = vmatmul.mubr.msk.f32.vlgmr.msra.gmra.mrb[0].mxu0 %vm311_vm8, %v304_v61 }
  0xb4   : > { %v309_v63 = vpop.permute.xlu1 %308 }
 0x17d   : > { %v381_v0 = vpop.f32.mrb[0].mxu0 }
 0x17e   : > { %v382_v1 = vadd.f32 %v381_v0, %v309_v63  ;;  %v383_v2 = vpop.f32.mrb[1].mxu0 }
 0x17f   : > { %v384_v3 = vadd.f32 %v383_v2, %v309_v63 }
 0x180   : > { %386 = vst [vmem:[%s206_s8] sm:$0xff] %v382_v1 }
 0x181   : > { %387 = vst [vmem:[%s206_s8 + $0x8] sm:$0xff] %v384_v3 }
 0x182 PF: > { %s13_s14 = sadd.s32 1, %s600_s14   ;;  %s679_s12 = smov %s596_s13 }
 0x183   : > { %p10_p5 = scmp.ge.s32.totalorder %s13_s14, 4   ;;  %s680_s13 = smov %s682_s15 }
 0x185   :  { %12 = sbr.rel (!%p10_p5) target bundleno = 2 (0x2), region = 62 }

</bundles_post_ra>
